<compile_context>
chip_gen: v7x
topology: tpu7x:2x2x1
jax: 0.10.0
libtpu: 0.0.40
codegen_flags: <defaults>
</compile_context>

<pallas_src>
from functools import partial

import jax
import jax.numpy as jnp
from jax.experimental import pallas as pl
from jax.experimental.pallas import tpu as pltpu


# ----------------------------------------------------------------------------- kernel
def _make_ce_kernel(HW, TP):
    """Per-pixel cross entropy on a (1, C, TP) logits tile / (1, 1, TP) label tile."""
    ragged = (HW % TP) != 0  # last pixel tile sticks out past HW -> mask garbage lanes

    def kernel(x_ref, y_ref, loss_ref):
        # x_ref: (1, C, TP) logits (f32 or bf16); y_ref: (1, 1, TP) int8/int32 labels;
        # loss_ref: (1, 1, TP) f32 per-pixel CE. Pixels on lanes, classes on sublanes,
        # so all reductions are cheap per-lane sublane reductions and every load/store
        # is lane-dense.
        x = x_ref[0].astype(jnp.float32)            # (C, TP) — f32 math on every gen
        y = y_ref[0].astype(jnp.int32)              # (1, TP)

        if ragged:
            # Zero the out-of-bounds lanes of the last tile before max/exp so nothing
            # non-finite enters the sublane reductions (their outputs are dropped on
            # the masked store anyway).
            start = pl.program_id(1) * TP
            lane = jax.lax.broadcasted_iota(jnp.int32, (1, TP), 1)
            x = jnp.where(lane < (HW - start), x, 0.0)

        # numerically stable logsumexp over classes (sublane axis)
        m = jnp.max(x, axis=0, keepdims=True)                                  # (1, TP)
        lse = jnp.log(jnp.sum(jnp.exp(x - m), axis=0, keepdims=True)) + m      # (1, TP)

        # gather logit at the gt label via one-hot compare (no dynamic gather on TPU)
        class_ids = jax.lax.broadcasted_iota(jnp.int32, x.shape, 0)
        logit_y = jnp.sum(jnp.where(class_ids == y, x, 0.0), axis=0, keepdims=True)

        # CE per pixel: -log_softmax(x)[y] = logsumexp(x) - x[y]
        loss_ref[0] = lse - logit_y

    return kernel


# ----------------------------------------------------------------------------- tiling
def _pick_pixel_tile(HW, tp_cap):
    """Pixel-tile size: lane-aligned (multiple of 128), as large as the VMEM budget
    allows, and an exact divisor of HW whenever a reasonably large one exists so the
    common case runs with no ragged tile and no padding at all."""
    if HW <= 128:
        return HW                                    # single block spans the pixel dim
    full128 = (HW // 128) * 128                      # largest lane-aligned tile <= HW
    cap = min(tp_cap, full128)
    if HW % 128 == 0:
        q = HW // 128
        for t in range(cap // 128, 0, -1):
            if q % t == 0:
                tp = 128 * t
                if 4 * tp >= cap or tp >= 8192:      # exact divisor, big enough: take it
                    return tp
                break
    return cap                                       # ragged last tile, masked in-kernel


def per_pixel_cross_entropy(preds, gt):
    """preds: [N, C, H, W] float (f32 or bf16), gt: [N, H, W] int.
    Returns [N*H*W] f32 losses in (n, h, w) pixel order
    (matches F.cross_entropy(preds, gt, reduction='none').view(-1))."""
    N, C, H, W = preds.shape
    HW = H * W

    # Native NCHW view: pixels (H*W) already contiguous per (n, c) -> lane-dense.
    x = preds.reshape(N, C, HW)
    # Shrink the label stream to 1 B/pixel when the class count allows it (the in-kernel
    # int8 -> int32 upcast is cheap VPU work hidden under the DMA).
    lbl_dtype = jnp.int8 if C <= 127 else jnp.int32
    y = gt.reshape(N, 1, HW).astype(lbl_dtype)

    in_bytes = x.dtype.itemsize
    lbl_bytes = y.dtype.itemsize

    # Generation-aware VMEM budget (v7x: 64 MiB/TC, v5e/v6e: 128 MiB).
    try:
        vmem_cap = int(pltpu.get_tpu_info().vmem_capacity_bytes)
    except Exception:
        vmem_cap = 64 << 20                          # conservative fallback (v7x)
    block_budget = (vmem_cap * 3) // 8               # double-buffered blocks + f32 temps
    # per-pixel bytes: double-buffered logits/label/loss blocks + ~4x C f32 temporaries
    # (f32 cast of x, exp(x - m), one-hot masked array, slack).
    per_pixel = 2 * (C * in_bytes + lbl_bytes + 4) + 4 * C * 4
    tp_cap = max(128, min(65536, (block_budget // per_pixel) // 128 * 128))

    TP = _pick_pixel_tile(HW, tp_cap)
    n_tiles = pl.cdiv(HW, TP)
    if N * n_tiles < 2 and HW >= 256:
        # Keep >= 2 grid blocks so v7x megacore has work for both TensorCores.
        TP = ((HW // 2 + 127) // 128) * 128
        n_tiles = pl.cdiv(HW, TP)

    kernel = _make_ce_kernel(HW, TP)
    vmem_limit = int(min(vmem_cap * 3 // 4, 96 << 20))

    loss = pl.pallas_call(
        kernel,
        out_shape=jax.ShapeDtypeStruct((N, 1, HW), jnp.float32),
        grid_spec=pltpu.PrefetchScalarGridSpec(
            num_scalar_prefetch=0,
            grid=(N, n_tiles),
            in_specs=[
                pl.BlockSpec((1, C, TP), lambda n, i: (n, 0, i)),
                pl.BlockSpec((1, 1, TP), lambda n, i: (n, 0, i)),
            ],
            out_specs=pl.BlockSpec((1, 1, TP), lambda n, i: (n, 0, i)),
        ),
        compiler_params=pltpu.CompilerParams(
            # both grid axes independent -> megacore sharding on v7x (2 TCs)
            dimension_semantics=("parallel", "parallel"),
            vmem_limit_bytes=vmem_limit,
        ),
    )(x, y)

    return loss.reshape(-1)


# ------------------------------------------------------------------- top-k bootstrapping
@partial(jax.jit, static_argnames="k")
def _topk_mean(x, k):
    """Exact mean of the k largest entries of x (x >= 0, e.g. CE losses).

    Replaces lax.top_k — which degenerates into a full sort for k ~ len(x) — with a
    32-step binary search over the order-preserving int32 bit pattern of non-negative
    f32, then one masked sum + tie correction. Every pass is a simple mem-bound sweep.
    """
    if k >= x.size:
        return jnp.mean(x)
    xs = jnp.where(x > 0.0, x, 0.0)       # CE >= 0; maps any -0.0 to +0.0 (monotone bits)
    xb = jax.lax.bitcast_convert_type(xs, jnp.int32)

    def count_ge(bits):
        return jnp.sum((xb >= bits).astype(jnp.int32))

    def body(_, lo_hi):
        lo, hi = lo_hi
        mid = lo + (hi - lo + 1) // 2
        ok = count_ge(mid) >= k
        return jnp.where(ok, mid, lo), jnp.where(ok, hi, mid - 1)

    # invariant: count_ge(lo) >= k; the k-th largest value's bits lie in [lo, hi]
    lo, _ = jax.lax.fori_loop(0, 32, body, (jnp.int32(0), jnp.max(xb)))
    thr = jax.lax.bitcast_convert_type(lo, jnp.float32)      # the k-th largest value

    gt_mask = xs > thr
    n_gt = jnp.sum(gt_mask.astype(jnp.int32))
    s_gt = jnp.sum(jnp.where(gt_mask, xs, 0.0))
    topk_sum = s_gt + (k - n_gt).astype(jnp.float32) * thr   # fill remaining slots with ties
    return topk_sum / k


def bootstrapped_ce(preds, gt, epoch, device="tpu",
                    start_warm=12, end_warm=45, top_p=0.15):
    """Semantics of BootstrappedCE.forward (epoch / device are Python scalars)."""
    # TODO(synk): torch CrossEntropyLoss default ignore_index=-100 not handled;
    # gt is assumed to contain only valid class ids (as in the reference module).
    raw_loss = per_pixel_cross_entropy(preds, gt)             # [N*H*W] f32

    if epoch < start_warm or device == "mps":
        # nn.CrossEntropyLoss() default: mean over all pixels
        return jnp.mean(raw_loss)

    num_pixels = raw_loss.size
    if epoch > end_warm:
        this_p = top_p
    else:
        this_p = top_p + (1.0 - top_p) * ((end_warm - epoch) / (end_warm - start_warm))
    # guard k >= 1 so tiny inputs / small top_p don't take a NaN mean of empty top-k
    # (reference torch.topk(..., 0).mean() would be NaN)
    k = max(1, int(num_pixels * this_p))
    return _topk_mean(raw_loss, k)


# --------------------------------------------------------------------------------- demo
if __name__ == "__main__":
    key = jax.random.PRNGKey(0)
    kp, kg = jax.random.split(key)

    def ref_ce(p, g):
        Cc = p.shape[1]
        xr = jnp.transpose(p, (0, 2, 3, 1)).reshape(-1, Cc).astype(jnp.float32)
        return -jax.nn.log_softmax(xr, axis=-1)[jnp.arange(xr.shape[0]), g.reshape(-1)]

    # --- main test: HW multiple of 128 -> exact-divisor tiles, f32 logits -----------
    N, C, H, W = 2, 4, 16, 16
    preds = jax.random.normal(kp, (N, C, H, W), dtype=jnp.float32)
    gt = jax.random.randint(kg, (N, H, W), 0, C, dtype=jnp.int32)

    loss_warm = bootstrapped_ce(preds, gt, epoch=5)      # warm-up: plain mean CE
    loss_boot = bootstrapped_ce(preds, gt, epoch=30)     # bootstrapped top-p mining
    loss_late = bootstrapped_ce(preds, gt, epoch=50)     # fully annealed (top_p)
    jax.block_until_ready((loss_warm, loss_boot, loss_late))

    ref_raw = ref_ce(preds, gt)
    raw = per_pixel_cross_entropy(preds, gt)
    assert jnp.allclose(raw, ref_raw, atol=1e-5, rtol=1e-5)
    assert jnp.allclose(loss_warm, jnp.mean(ref_raw), atol=1e-5, rtol=1e-5)

    this_p30 = 0.15 + (1.0 - 0.15) * ((45 - 30) / (45 - 12))
    k30 = max(1, int(ref_raw.size * this_p30))
    ref_boot = jnp.mean(jax.lax.top_k(ref_raw, k30)[0])
    assert jnp.allclose(loss_boot, ref_boot, atol=1e-5, rtol=1e-5)

    k50 = max(1, int(ref_raw.size * 0.15))
    ref_late = jnp.mean(jax.lax.top_k(ref_raw, k50)[0])
    assert jnp.allclose(loss_late, ref_late, atol=1e-5, rtol=1e-5)

    # --- ragged test: HW not a multiple of 128 -> masked last tile, no padding ------
    N2, C2, H2, W2 = 2, 3, 20, 20
    preds2 = jax.random.normal(jax.random.PRNGKey(1), (N2, C2, H2, W2), jnp.float32)
    gt2 = jax.random.randint(jax.random.PRNGKey(2), (N2, H2, W2), 0, C2, jnp.int32)
    raw2 = per_pixel_cross_entropy(preds2, gt2)
    assert jnp.allclose(raw2, ref_ce(preds2, gt2), atol=1e-5, rtol=1e-5)

    # --- bf16 logit stream (kernel upcasts to f32 internally) -----------------------
    raw_bf16 = per_pixel_cross_entropy(preds.astype(jnp.bfloat16), gt)
    ref_bf16 = ref_ce(preds.astype(jnp.bfloat16).astype(jnp.float32), gt)
    assert jnp.allclose(raw_bf16, ref_bf16, atol=1e-4, rtol=1e-4)

    print("KERNEL_OK")
</pallas_src>

<mosaic_0001>
module attributes {stable_mosaic.version = 11 : i64} {
  func.func @kernel(%arg0: i32, %arg1: i32, %arg2: memref<1x4x256xf32, #tpu.memory_space<vmem>>, %arg3: memref<1x1x256xi8, #tpu.memory_space<vmem>>, %arg4: memref<1x1x256xf32, #tpu.memory_space<vmem>>) attributes {dimension_semantics = [#tpu.dimension_semantics<parallel>, #tpu.dimension_semantics<parallel>], iteration_bounds = array<i64: 2, 1>, scalar_prefetch = 0 : i64, scratch_operands = 0 : i64, tpu.core_type = #tpu.core_type<tc>, window_params = [{transform_indices = @transform_0, window_bounds = array<i64: 1, 4, 256>}, {transform_indices = @transform_1, window_bounds = array<i64: 1, 1, 256>}, {transform_indices = @transform_2, window_bounds = array<i64: 1, 1, 256>}]} {
    %c0 = arith.constant 0 : index
    %c0_0 = arith.constant 0 : index
    %c0_1 = arith.constant 0 : index
    %0 = vector.load %arg2[%c0, %c0_0, %c0_1] : memref<1x4x256xf32, #tpu.memory_space<vmem>>, vector<1x4x256xf32>
    %1 = vector.shape_cast %0 : vector<1x4x256xf32> to vector<4x256xf32>
    %c0_2 = arith.constant 0 : index
    %c0_3 = arith.constant 0 : index
    %c0_4 = arith.constant 0 : index
    %2 = vector.load %arg3[%c0_2, %c0_3, %c0_4] : memref<1x1x256xi8, #tpu.memory_space<vmem>>, vector<1x1x256xi8>
    %3 = vector.shape_cast %2 : vector<1x1x256xi8> to vector<1x256xi8>
    %4 = arith.extsi %3 : vector<1x256xi8> to vector<1x256xi32>
    %cst = arith.constant dense<0xFF800000> : vector<256xf32>
    %5 = vector.multi_reduction <maximumf>, %1, %cst [0] : vector<4x256xf32> to vector<256xf32>
    %6 = vector.shape_cast %5 : vector<256xf32> to vector<1x256xf32>
    %7 = vector.broadcast %6 : vector<1x256xf32> to vector<4x256xf32>
    %8 = arith.subf %1, %7 : vector<4x256xf32>
    %9 = math.exp %8 : vector<4x256xf32>
    %cst_5 = arith.constant dense<0.000000e+00> : vector<256xf32>
    %10 = vector.multi_reduction <add>, %9, %cst_5 [0] : vector<4x256xf32> to vector<256xf32>
    %11 = vector.shape_cast %10 : vector<256xf32> to vector<1x256xf32>
    %12 = math.log %11 : vector<1x256xf32>
    %13 = arith.addf %12, %6 : vector<1x256xf32>
    %14 = tpu.iota {dimensions = array<i32: 0>} : vector<4x256xi32>
    %15 = vector.broadcast %4 : vector<1x256xi32> to vector<4x256xi32>
    %16 = arith.cmpi eq, %14, %15 : vector<4x256xi32>
    %cst_6 = arith.constant 0.000000e+00 : f32
    %17 = vector.broadcast %cst_6 : f32 to vector<4x256xf32>
    %18 = arith.select %16, %1, %17 : vector<4x256xi1>, vector<4x256xf32>
    %cst_7 = arith.constant dense<0.000000e+00> : vector<256xf32>
    %19 = vector.multi_reduction <add>, %18, %cst_7 [0] : vector<4x256xf32> to vector<256xf32>
    %20 = vector.shape_cast %19 : vector<256xf32> to vector<1x256xf32>
    %21 = arith.subf %13, %20 : vector<1x256xf32>
    %c0_8 = arith.constant 0 : index
    %c0_9 = arith.constant 0 : index
    %c0_10 = arith.constant 0 : index
    %22 = vector.load %arg4[%c0_8, %c0_9, %c0_10] : memref<1x1x256xf32, #tpu.memory_space<vmem>>, vector<1x1x256xf32>
    %23 = vector.shape_cast %22 : vector<1x1x256xf32> to vector<1x256xf32>
    %24 = vector.shape_cast %21 : vector<1x256xf32> to vector<1x1x256xf32>
    tpu.vector_store %arg4[%c0_8, %c0_9, %c0_10], %24 {strides = array<i32>} : memref<1x1x256xf32, #tpu.memory_space<vmem>>, vector<1x1x256xf32>,
    return
  }
  func.func @transform_0(%arg0: i32, %arg1: i32) -> (i32, i32, i32) {
    %c0_i32 = arith.constant 0 : i32
    %c0_i32_0 = arith.constant 0 : i32
    return %arg0, %c0_i32, %arg1 : i32, i32, i32
  }
  func.func @transform_1(%arg0: i32, %arg1: i32) -> (i32, i32, i32) {
    %c0_i32 = arith.constant 0 : i32
    %c0_i32_0 = arith.constant 0 : i32
    return %arg0, %c0_i32, %arg1 : i32, i32, i32
  }
  func.func @transform_2(%arg0: i32, %arg1: i32) -> (i32, i32, i32) {
    %c0_i32 = arith.constant 0 : i32
    %c0_i32_0 = arith.constant 0 : i32
    return %arg0, %c0_i32, %arg1 : i32, i32, i32
  }
}

</mosaic_0001>

<bundles_post_ra>
// kernel: tpu_custom_call.1
= control target key start
LH: loop header
LB: loop body
LE: loop exit
PB: predicated region body
PF: predicated region fallthrough
CT: control target
= control target key end

     0   :  { %7 = vsyncpa [#allocation3], 0  ;;  %s847_s0 = inlined_call_operand.hbm [shape: f32[2,4,256], index: 0, kind: input, shape index: {}]   ;;  %s848_s1 = inlined_call_operand.vmem [shape: s8[2,1,256], index: 1, kind: input, shape index: {}]   ;;  %s849_s2 = inlined_call_operand.hbm [shape: f32[2,1,256], index: 2, kind: output, shape index: {}]  }
   0x1   :  { %9 = vsyncpa [#allocation3 + $0x1], 0 }
   0x2   :  { %10 = vsyncpa [#allocation4], 0 }
   0x3   :  { %12 = vsyncpa [#allocation4 + $0x1], 0  ;;  %s661_s9 = smov 0   ;;  %s663_s10 = smov 0  }
   0x4   :  { %s665_s11 = smov 0   ;;  %s667_s12 = smov 0  }
   0x5   :  { %s669_s13 = smov 0   ;;  %s671_s14 = smov 0  }
   0x6 LB: > { %s441_s15 = sadd.s32 4294967295, %s641_s14   ;;  %s442_s16 = sadd.s32 4294967294, %s641_s14   ;;  %s641_s14 = sphi %s671_s14, %s18_s14   ;;  %s637_s13 = sphi %s669_s13, %s865_s13   ;;  %s633_s12 = sphi %s667_s12, %s864_s12   ;;  %s629_s11 = sphi %s665_s11, %s863_s11   ;;  %s625_s10 = sphi %s663_s10, %s862_s10   ;;  %s621_s9 = sphi %s661_s9, %s861_s9  }
   0x7   : > { %s30_s17 = sadd.s32 1, %s637_s13  ;;  %s39_s18 = sadd.s32 1, %s629_s11 }
   0x8   : > { %p32_p0 = scmp.ge.s32.totalorder %s30_s17, 2  ;;  %p46_p1 = scmp.ne.s32.totalorder %s629_s11, %s625_s10 }
   0x9   : > { %p47_p2 = scmp.eq.s32.totalorder %s641_s14, 0  ;;  %p52_p3 = scmp.ne.s32.totalorder %s625_s10, %s621_s9 }
   0xa   : > { %s867_s17 = smov (%p32_p0, %s30_s17), 0  ;;  %p53_p5 = scmp.eq.s32.totalorder %s441_s15, 0 }
   0xb   : > { %p702_p4 = por %p47_p2, %p46_p1  ;;  %s34_s20 = ssub.s32 %s637_s13, %s867_s17 }
   0xc   : > { %p106_p6 = scmp.eq.s32.totalorder %s441_s15, 1  ;;  %p37_p7 = scmp.eq.s32.totalorder %s34_s20, 0 }
   0xd   : > { %p708_p8 = por %p53_p5, %p52_p3  ;;  %p112_p10 = scmp.eq.s32.totalorder %s442_s16, 1 }
   0xe   : > { %p712_p9 = por %p106_p6, %p46_p1  ;;  %p471_p13 = scmp.lt.s32.totalorder %s641_s14, 2 }
   0xf   : > { %s717_s23 = scalar_select %p37_p7, %s629_s11, %s39_s18  }
  0x10   : > { %s853_s22 = scalar_select %p712_p9, 1, 0 }
  0x11   : > { %p719_p11 = por %p112_p10, %p52_p3  ;;  %s132_s25 = sand.u32 1, %s629_s11  }
  0x12   : > { %s445_s26 = sshll.u32 %s132_s25, 3  ;;  %s457_s27 = sshll.u32 %s637_s13, 7 }
  0x13   : > { %s854_s24 = scalar_select %p719_p11, 1, 0 }
  0x14   : > { %s730_s30 = scalar_lea.hbm %s847_s0, %s457_s27  ;;  %s136_s3 = scalar_lea.vmem [#allocation2], %s445_s26 }
  0x15   : > { %s146_s4 = sshll.u32 %s136_s3, 4  ;;  %p736_p0 = pnand %p471_p13, %p702_p4  ;;  %s732_s4 = int_to_ptr.vmem [resolvable:$true] %s146_s4 }
  0x16   : > { %s133_s6 = scalar_lea.sflag [#allocation3], %s132_s25  ;;  %s529_s7 = scalar_lea.hbm %s730_s30, 128 }
  0x17   : > { %p530_p3 = scmp.ne.s32.totalorder %s730_s30, %s529_s7  ;;  %p531_p5 = pneg %p736_p0 }
  0x18   : > { %s534_s16 = scalar_lea.hbm %s847_s0, 256  ;;  %p535_p4 = scmp.lt.u32.totalorder %s730_s30, %s847_s0 }
  0x19   : > { %p532_p6 = pnand %p531_p5, %p530_p3  ;;  %p536_p10 = scmp.lt.u32.totalorder %s534_s16, %s529_s7 }
  0x1a   : > { %p538_p12 = scmp.lt.u32.totalorder %s529_s7, %s730_s30 }
  0x1b   : > { %p533_p7 = pneg %p532_p6  ;;  %p537_p13 = por %p536_p10, %p535_p4 }
  0x1d   : > { %p539_p1 = por %p538_p12, %p537_p13 }
  0x1f   : > { %p540_p2 = pnand %p539_p1, %p533_p7 }
  0x21   : > { %543 = shalt.err (!%p540_p2)
}
  0x22   : > { %s544_s20 = scalar_lea.vmem %s732_s4, 128  ;;  %s643_s25 = smov [#allocation2]  }
  0x23   : > { %p545_p3 = scmp.ne.s32.totalorder %s732_s4, %s544_s20  ;;  %s549_s26 = sshll.u32 %s643_s25, 4  ;;  %s550_s26 = int_to_ptr.vmem [resolvable:$false] %s549_s26 }
  0x24   : > { %s551_s27 = scalar_lea.vmem %s550_s26, 256  ;;  %p552_p9 = scmp.lt.s32.totalorder %s732_s4, %s550_s26 }
  0x25   : > { %p547_p6 = pnand %p545_p3, %p531_p5  ;;  %p553_p4 = scmp.lt.s32.totalorder %s551_s27, %s544_s20 }
  0x27   : > { %p548_p11 = pneg %p547_p6  ;;  %p554_p10 = por %p553_p4, %p552_p9 }
  0x29   : > { %p555_p12 = pnand %p554_p10, %p548_p11 }
  0x2b   : > { %558 = shalt.err (!%p555_p12)
}
  0x2c   : > { %466 = dma.hbm_to_vmem [thread:$0]  (!%p736_p0), %s730_s30, 128, %s732_s4, %s133_s6  }
  0x2d   : > { %p856_p1 = scmp.lt.s32.totalorder %s641_s14, 3  ;;  %p857_p2 = scmp.ge.s32.totalorder %s641_s14, 1 }
  0x2f   : > { %p164_p5 = pnand %p857_p2, %p856_p1 }
  0x30   : > { %s772_s28 = sand.u32 (!%p164_p5), 1, %s625_s10  }
  0x31   : > { %167 = sbr.rel (%p164_p5) target bundleno = 142 (0x8e), region = 28  ;;  %s449_s29 = sshll.u32 (!%p164_p5), %s772_s28, 3 }
  0x32   : > { %s170_s3 = scalar_lea.sflag (!%p164_p5), [#allocation3], %s772_s28  ;;  %s173_s7 = scalar_lea.vmem (!%p164_p5), [#allocation2], %s449_s29 }
  0x38   : > { %612 = dma.done.wait (%p708_p8), %s170_s3, 128  }
  0x39   : > { %614 = vsyncadd (%p708_p8), %s170_s3, 4294967168  ;;  %vm219_vm0 = vcmask 1043456   ;;  %p204_p9 = scmp.lt.s32.totalorder %s633_s12, 1  ;;  %v213_v0 = vld [vmem:[%s173_s7] sm:$0xff]  ;;  %v264_v11 = vlaneseq  ;;  %v644_v59 = vmov 1966171168  }
  0x3a   : > { %v217_v1 = vcombine.high %v213_v0, %v213_v0  ;;  %v220_v2 = vsel %vm219_vm0, %v213_v0, -inf  ;;  %v306_v60 = vunpack.c.l.s4 %v644_v59  ;;  %s450_s8 = sshll.u32 %s772_s28, 1  ;;  %s458_s18 = sshll.u32 %s633_s12, 5 }
  0x3b   : > { %v221_v3 = vrot.slane %v220_v2, 4  ;;  %s205_s30 = scalar_select %p204_p9, %s633_s12, 1  ;;  %v265_v16 = vshrl.u32 %v264_v11, 7  ;;  %vm322_vm3 = vcmp.lt.s32.totalorder %v264_v11, 256 }
  0x3c   : > { %v227_v4 = vsel %vm219_vm0, %v217_v1, -inf  ;;  %s201_s15 = scalar_lea.vmem [#allocation5], %s450_s8  ;;  %s800_s25 = scalar_lea.hbm %s849_s2, %s458_s18 }
  0x3d   : > { %v222_v5 = vmax.f32 %v220_v2, %v221_v3  ;;  %v228_v6 = vrot.slane %v227_v4, 4  ;;  %s451_s4 = sshll.u32 %s205_s30, 1  ;;  %v268_v21 = vsub.s32 0, %v265_v16  ;;  %v272_v23 = vsub.s32 4, %v265_v16  ;;  %s342_s16 = sshll.u32 %s201_s15, 4  ;;  %s795_s16 = int_to_ptr.vmem [resolvable:$true] %s342_s16 }
  0x3e   : > { %s210_s6 = scalar_lea.vmem %s848_s1, %s451_s4  ;;  %s326_s26 = scalar_lea.sflag [#allocation4], %s772_s28 }
  0x3f   : > { %v223_v7 = vrot.slane %v222_v5, 2  ;;  %v229_v8 = vmax.f32 %v227_v4, %v228_v6  ;;  %v214_v17 = vld [vmem:[%s210_s6] sm:$0x3]  ;;  %v307_v4 = vunpack.c.0.s8 %v306_v60  ;;  %s559_s27 = scalar_lea.vmem %s795_s16, 32  ;;  %p858_p11 = scmp.ne.s32.totalorder %s853_s22, 0 }
  0x40   : > { %v215_v19 = vunpack.c.0.s8 %v214_v17  ;;  %p560_p8 = scmp.ne.s32.totalorder %s795_s16, %s559_s27  ;;  %s645_s12 = smov [#allocation5]  }
  0x41   : > { %v224_v9 = vmax.f32 %v222_v5, %v223_v7  ;;  %v230_v10 = vrot.slane %v229_v8, 2  ;;  %s563_s29 = sshll.u32 %s645_s12, 4  ;;  %s564_s29 = int_to_ptr.vmem [resolvable:$false] %s563_s29 }
  0x42   : > { %v269_v25 = vrot.slane %v215_v19, %v268_v21  ;;  %v273_v26 = vrot.slane %v215_v19, %v272_v23  ;;  %p561_p0 = pnand %p560_p8, %p858_p11  ;;  %s565_s3 = scalar_lea.vmem %s564_s29, 64 }
  0x43   : > { %v225_v12 = vrot.slane %v224_v9, 1  ;;  %v231_v13 = vmax.f32 %v229_v8, %v230_v10  ;;  %v310_v8 = vsub.s32 %v307_v4, %v265_v16  ;;  %p566_p13 = scmp.lt.s32.totalorder %s795_s16, %s564_s29  ;;  %p567_p3 = scmp.lt.s32.totalorder %s565_s3, %s559_s27 }
  0x44   : > { %v277_v27 = vrot.slane %v269_v25, %v268_v21  ;;  %v281_v28 = vrot.slane %v273_v26, %v268_v21  ;;  %p562_p7 = pneg %p561_p0 }
  0x45   : > { %v226_v14 = vmax.f32 %v224_v9, %v225_v12  ;;  %v232_v15 = vrot.slane %v231_v13, 1  ;;  %p568_p6 = por %p567_p3, %p566_p13 }
  0x46   : > { %vm282_vm1 = vcmp.eq.s32.totalorder %v265_v16, %v277_v27  ;;  %vm283_vm2 = vcmp.eq.s32.totalorder %v265_v16, %v281_v28 }
  0x47   : > { %v233_v18 = vmax.f32 %v231_v13, %v232_v15  ;;  %v284_v29 = vsel %vm282_vm1, %v213_v0, 0.0  ;;  %v285_v33 = vsel %vm283_vm2, %v217_v1, 0.0  ;;  %p569_p4 = pnand %p568_p6, %p562_p7 }
  0x48   : > { %v286_v35 = vsel %vm219_vm0, %v284_v29, 0.0  ;;  %v293_v39 = vsel %vm219_vm0, %v285_v33, 0.0 }
  0x49   : > { %v236_v20 = vcombine.low %v226_v14, %v233_v18  ;;  %v287_v40 = vrot.slane %v286_v35, 4  ;;  %v294_v43 = vrot.slane %v293_v39, 4 }
  0x4b   : > { %v238_v22 = vsub.f32 %v213_v0, %v236_v20  ;;  %v288_v46 = vadd.f32 %v287_v40, %v286_v35  ;;  %v295_v49 = vadd.f32 %v294_v43, %v293_v39 }
  0x4d   : > { %v239_v24 = vmul.f32 1.442695, %v238_v22  ;;  %v289_v52 = vrot.slane %v288_v46, 2  ;;  %v296_v54 = vrot.slane %v295_v49, 2 }
  0x4f   : > { %523 = vpow2.f32 %v239_v24  ;;  %v290_v55 = vadd.f32 %v289_v52, %v288_v46  ;;  %v297_v56 = vadd.f32 %v296_v54, %v295_v49 }
  0x51   : > { %v291_v57 = vrot.slane %v290_v55, 1  ;;  %v298_v58 = vrot.slane %v297_v56, 1 }
  0x53   : > { %v292_v63 = vadd.f32 %v291_v57, %v290_v55  ;;  %v299_v3 = vadd.f32 %v298_v58, %v297_v56 }
  0x59   : > { %v524_v30 = vpop.eup %523 }
  0x5a   : > { %v242_v31 = vcombine.high %v524_v30, %v524_v30  ;;  %v244_v32 = vsel %vm219_vm0, %v524_v30, 0.0 }
  0x5b   : > { %v245_v34 = vrot.slane %v244_v32, 4 }
  0x5c   : > { %v251_v36 = vsel %vm219_vm0, %v242_v31, 0.0 }
  0x5d   : > { %v246_v37 = vadd.f32 %v245_v34, %v244_v32  ;;  %v252_v38 = vrot.slane %v251_v36, 4 }
  0x5f   : > { %v247_v41 = vrot.slane %v246_v37, 2  ;;  %v253_v42 = vadd.f32 %v252_v38, %v251_v36 }
  0x61   : > { %v248_v44 = vadd.f32 %v247_v41, %v246_v37  ;;  %v254_v45 = vrot.slane %v253_v42, 2 }
  0x63   : > { %v249_v47 = vrot.slane %v248_v44, 1  ;;  %v255_v48 = vadd.f32 %v254_v45, %v253_v42 }
  0x65   : > { %v250_v50 = vadd.f32 %v249_v47, %v248_v44  ;;  %v256_v51 = vrot.slane %v255_v48, 1 }
  0x67   : > { %v257_v53 = vadd.f32 %v256_v51, %v255_v48  ;;  %525 = vlog2.f32 %v250_v50 }
  0x69   : > { %527 = vlog2.f32 %v257_v53 }
  0x71   : > { %v526_v61 = vpop.eup %525 }
  0x72   : > { %v259_v62 = vmul.f32 0.6931472, %v526_v61 }
  0x73   : > { %v528_v0 = vpop.eup %527 }
  0x74   : > { %v261_v1 = vmul.f32 0.6931472, %v528_v0  ;;  %v262_v2 = vadd.f32 %v259_v62, %v226_v14 }
  0x76   : > { %v263_v5 = vadd.f32 %v261_v1, %v233_v18  ;;  %v300_v6 = vsub.f32 %v262_v2, %v292_v63 }
  0x78   : > { %v301_v7 = vsub.f32 %v263_v5, %v299_v3 }
  0x7a   : > { %v304_v9 = vcombine.low %v300_v6, %v301_v7 }
  0x7c   : > { %v311_v10 = vrot.slane %v304_v9, %v310_v8 }
  0x7e   : > { %v318_v12 = vrot.slane %v311_v10, %v310_v8 }
  0x80   : > { %324 = vst.msk [vmem:[%s201_s15] sm:$0x3] %vm322_vm3, %v318_v12 }
  0x81   : > { %572 = shalt.err (!%p569_p4)
}
  0x82   : > { %s573_s28 = scalar_lea.hbm %s800_s25, 32  ;;  %s577_s4 = scalar_lea.hbm %s849_s2, 64 }
  0x83   : > { %p574_p10 = scmp.ne.s32.totalorder %s800_s25, %s573_s28  ;;  %p578_p2 = scmp.lt.u32.totalorder %s800_s25, %s849_s2 }
  0x84   : > { %p579_p5 = scmp.lt.u32.totalorder %s577_s4, %s573_s28  ;;  %p581_p8 = scmp.lt.u32.totalorder %s573_s28, %s800_s25 }
  0x85   : > { %p575_p12 = pnand %p574_p10, %p858_p11 }
  0x86   : > { %p580_p9 = por %p579_p5, %p578_p2 }
  0x87   : > { %p576_p1 = pneg %p575_p12 }
  0x88   : > { %p582_p0 = por %p581_p8, %p580_p9 }
  0x8a   : > { %p583_p7 = pnand %p582_p0, %p576_p1 }
  0x8c   : > { %586 = shalt.err (!%p583_p7)
}
  0x8d   : > { %461 = dma.vmem_to_hbm [thread:$0]  (%p858_p11), %s795_s16, 32, %s800_s25, %s326_s26  }
  0x8e PF: > { %s354_s6 = sand.u32 1, %s621_s9   ;;  %p859_p13 = scmp.ne.s32.totalorder %s854_s24, 0 }
  0x8f   : > { %p860_p3 = scmp.ge.s32.totalorder %s641_s14, 2  ;;  %s355_s8 = scalar_lea.sflag [#allocation4], %s354_s6 }
  0x91   : > { %p468_p6 = pnand %p860_p3, %p859_p13 }
  0x93   : > { %616 = dma.done.wait (!%p468_p6), %s355_s8, 32  }
  0x94   : > { %618 = vsyncadd (!%p468_p6), %s355_s8, 4294967264  ;;  %s18_s14 = sadd.s32 1, %s641_s14   ;;  %s861_s9 = smov %s625_s10 }
  0x95   : > { %p15_p4 = scmp.ge.s32.totalorder %s18_s14, 4   ;;  %s862_s10 = smov %s629_s11 }
  0x96   : > { %s863_s11 = smov %s717_s23  ;;  %s864_s12 = smov %s637_s13 }
  0x97   : > { %s865_s13 = smov %s867_s17  ;;  %17 = sbr.rel (!%p15_p4) target bundleno = 6 (0x6), region = 76 }
  0x9e   :  { %360 = vsyncpa [#allocation3], 1 }
  0x9f   :  { %362 = vsyncpa [#allocation3 + $0x1], 1 }
  0xa0   :  { %363 = vsyncpa [#allocation4], 1 }
  0xa1   :  { %365 = vsyncpa [#allocation4 + $0x1], 1 }

</bundles_post_ra>
